<compile_context>
chip_gen: v7x
topology: tpu7x:2x2x1
jax: 0.10.0
libtpu: 0.0.40
codegen_flags: <defaults>
</compile_context>

<pallas_src>
import functools

import jax
import jax.numpy as jnp
from jax.experimental import pallas as pl
from jax.experimental.pallas import tpu as pltpu


def _round_up(x, m):
    return ((x + m - 1) // m) * m


def lora_kernel(x_ref, wt_ref, b_ref, xa_ref, bb_ref, o_ref, acc_ref):
    """Grid = (M/tm, N/tn, K/tk); k (innermost) is the reduction axis.

    x_ref  : [tm, tk]  activation tile          (compute dtype)
    wt_ref : [tk, tn]  W^T tile                 (compute dtype)
    b_ref  : [1,  tn]  bias tile                (f32)
    xa_ref : [tm, Rp]  precomputed x @ A tile   (compute dtype)
    bb_ref : [Rp, tn]  LoRA B tile              (compute dtype)
    o_ref  : [tm, tn]  output tile
    acc_ref: [tm, tn]  f32 accumulator scratch
    """
    k = pl.program_id(2)

    @pl.when(k == 0)
    def _():
        # Fold the bias into the accumulator init (saves an epilogue add).
        acc_ref[...] = jnp.broadcast_to(b_ref[...], acc_ref.shape).astype(jnp.float32)

    # Base path: partial x_tile @ W^T_tile, f32 accumulation on the MXU.
    acc_ref[...] += jnp.dot(x_ref[...], wt_ref[...],
                            preferred_element_type=jnp.float32)        # [tm, tn]

    @pl.when(k == pl.num_programs(2) - 1)
    def _():
        # Epilogue: tiny LoRA second matmul, once per (i, j) output tile.
        upd = jnp.dot(xa_ref[...], bb_ref[...],
                      preferred_element_type=jnp.float32)              # [tm, tn]
        o_ref[...] = (acc_ref[...] + upd).astype(o_ref.dtype)


def make_lora_layer(w, bias, lora_a, lora_b, *, tm=256, tn=512, tk=1024,
                    rank_pad=128, compute_dtype=jnp.bfloat16):
    """Prepare a LoRA linear layer for the Pallas kernel.

    w:      [N, K]  (PyTorch nn.Linear weight layout)
    bias:   [N]
    lora_a: [K, R]
    lora_b: [R, N]

    Returns f(x: [M, K]) -> [M, N].  All layout prep (transpose, padding to
    tile/lane multiples, dtype casts) is done ONCE here.
    """
    N, K = w.shape
    R = lora_a.shape[1]

    tn = min(tn, _round_up(N, 128))
    tk = min(tk, _round_up(K, 128))
    Np = _round_up(N, tn)
    Kp = _round_up(K, tk)
    Rp = _round_up(max(R, rank_pad), 128)      # pad rank to a full lane group

    cbytes = jnp.dtype(compute_dtype).itemsize
    # Rows per vreg sublane group for the compute dtype (f32: 8, bf16: 16).
    row_mult = max(8, 32 // cbytes)

    # One-time weight transpose + zero-padding (zeros contribute nothing).
    w_t = jnp.pad(jnp.transpose(w), ((0, Kp - K), (0, Np - N))).astype(compute_dtype)
    a_p = jnp.pad(lora_a, ((0, Kp - K), (0, Rp - R))).astype(compute_dtype)
    b_p = jnp.pad(lora_b, ((0, Rp - R), (0, Np - N))).astype(compute_dtype)
    bias_p = jnp.pad(bias, (0, Np - N)).reshape(1, Np).astype(jnp.float32)

    out_dtype = jnp.result_type(w.dtype)
    obytes = jnp.dtype(out_dtype).itemsize

    # TODO(synk): optional int8 (v5e/v6e) / fp8 (v7x) W^T storage with
    # per-channel dequant scales in the epilogue for another ~2x in the
    # memory-bound serving regime.

    @jax.jit
    def forward(x):
        M = x.shape[0]
        tm_ = min(tm, _round_up(M, row_mult))
        Mp = _round_up(M, tm_)
        x_p = jnp.pad(x, ((0, Mp - M), (0, Kp - K))).astype(compute_dtype)

        # LoRA A-projection hoisted out of the kernel's K loop: one small XLA
        # dot per forward (Mp x Kp x Rp), f32 accumulation, cast once.
        xa = jnp.dot(x_p, a_p,
                     preferred_element_type=jnp.float32).astype(compute_dtype)

        grid = (Mp // tm_, Np // tn, Kp // tk)

        flops = 2 * Mp * Np * Kp + 2 * Mp * Rp * Np
        bytes_accessed = (
            (Mp * Kp + Kp * tn * (Np // tn) + Mp * Rp + Rp * Np) * cbytes  # x, W^T, xa, B
            + Np * 4                                                       # bias (f32)
            + Mp * Np * obytes                                             # output
        )

        # Double-buffered VMEM footprint + f32 accumulator, with headroom.
        vmem_bytes = (
            2 * (tm_ * tk * cbytes          # x
                 + tk * tn * cbytes         # W^T
                 + tn * 4                   # bias
                 + tm_ * Rp * cbytes        # xa
                 + Rp * tn * cbytes         # B
                 + tm_ * tn * obytes)       # output
            + tm_ * tn * 4                  # accumulator scratch
        )
        vmem_limit = int(min(vmem_bytes * 3 // 2 + (4 << 20), 128 << 20))

        out_p = pl.pallas_call(
            lora_kernel,
            out_shape=jax.ShapeDtypeStruct((Mp, Np), out_dtype),
            grid_spec=pltpu.PrefetchScalarGridSpec(
                num_scalar_prefetch=0,
                grid=grid,
                in_specs=[
                    pl.BlockSpec((tm_, tk), lambda i, j, k: (i, k)),   # x
                    pl.BlockSpec((tk, tn), lambda i, j, k: (k, j)),    # W^T
                    pl.BlockSpec((1, tn), lambda i, j, k: (0, j)),     # bias
                    pl.BlockSpec((tm_, Rp), lambda i, j, k: (i, 0)),   # x @ A
                    pl.BlockSpec((Rp, tn), lambda i, j, k: (0, j)),    # B
                ],
                out_specs=pl.BlockSpec((tm_, tn), lambda i, j, k: (i, j)),
                scratch_shapes=[
                    pltpu.VMEM((tm_, tn), jnp.float32),   # f32 accumulator
                ],
            ),
            compiler_params=pltpu.CompilerParams(
                dimension_semantics=("parallel", "parallel", "arbitrary"),
                vmem_limit_bytes=vmem_limit),
            cost_estimate=pl.CostEstimate(
                flops=flops, transcendentals=0, bytes_accessed=bytes_accessed),
        )(x_p, w_t, bias_p, xa, b_p)

        return out_p[:M, :N].astype(x.dtype)

    return forward


def lora_ref(x, w, bias, lora_a, lora_b, compute_dtype=jnp.bfloat16):
    """Pure-JAX reference matching the PyTorch module, at the kernel's
    compute precision (inputs cast to compute_dtype, f32 accumulation)."""
    cd = compute_dtype
    xc = x.astype(cd)
    base = jnp.dot(xc, jnp.transpose(w).astype(cd),
                   preferred_element_type=jnp.float32) + bias.astype(jnp.float32)
    xa = jnp.dot(xc, lora_a.astype(cd),
                 preferred_element_type=jnp.float32).astype(cd)
    upd = jnp.dot(xa, lora_b.astype(cd), preferred_element_type=jnp.float32)
    return (base + upd).astype(x.dtype)


if __name__ == "__main__":
    key = jax.random.PRNGKey(0)

    # ---- Check 1: spec-sized shapes, lora_B = zeros (matches module init) ----
    batch, in_features, out_features, rank = 8, 32, 64, 4
    k1, k2, k3, k4 = jax.random.split(key, 4)
    x = jax.random.normal(k1, (batch, in_features), jnp.float32)
    w = jax.random.normal(k2, (out_features, in_features), jnp.float32) * 0.1
    bias = jax.random.normal(k3, (out_features,), jnp.float32) * 0.1
    lora_a = jax.random.normal(k4, (in_features, rank), jnp.float32)
    lora_b = jnp.zeros((rank, out_features), jnp.float32)

    fwd = make_lora_layer(w, bias, lora_a, lora_b)
    out = fwd(x)
    jax.block_until_ready(out)
    ref = lora_ref(x, w, bias, lora_a, lora_b)
    assert out.shape == (batch, out_features)
    assert jnp.allclose(out, ref, atol=1e-2, rtol=1e-2)

    # ---- Check 2: exercises the full (i, j, k) grid, padding, and a
    #      non-zero LoRA update path.  Kp = 2048 (k grid = 2), Np = 1024
    #      (j grid = 2) with the default tn=512 / tk=1024 tiles. ----
    batch2, in2, out2, rank2 = 32, 1536, 768, 8
    k5, k6, k7, k8, k9 = jax.random.split(jax.random.PRNGKey(1), 5)
    x2 = jax.random.normal(k5, (batch2, in2), jnp.float32) * 0.1
    w2 = jax.random.normal(k6, (out2, in2), jnp.float32) * 0.1
    bias2 = jax.random.normal(k7, (out2,), jnp.float32) * 0.1
    a2 = jax.random.normal(k8, (in2, rank2), jnp.float32) * 0.1
    b2 = jax.random.normal(k9, (rank2, out2), jnp.float32) * 0.1

    fwd2 = make_lora_layer(w2, bias2, a2, b2)
    out2_ = fwd2(x2)
    jax.block_until_ready(out2_)
    ref2 = lora_ref(x2, w2, bias2, a2, b2)
    assert out2_.shape == (batch2, out2)
    assert jnp.allclose(out2_, ref2, atol=2e-2, rtol=2e-2)

    print("KERNEL_OK")
</pallas_src>

<mosaic_0001>
module attributes {stable_mosaic.version = 11 : i64} {
  func.func @lora_kernel(%arg0: i32, %arg1: i32, %arg2: i32, %arg3: memref<16x128xbf16, #tpu.memory_space<vmem>>, %arg4: memref<128x128xbf16, #tpu.memory_space<vmem>>, %arg5: memref<1x128xf32, #tpu.memory_space<vmem>>, %arg6: memref<16x128xbf16, #tpu.memory_space<vmem>>, %arg7: memref<128x128xbf16, #tpu.memory_space<vmem>>, %arg8: memref<16x128xf32, #tpu.memory_space<vmem>>, %arg9: memref<16x128xf32, #tpu.memory_space<vmem>>) attributes {dimension_semantics = [#tpu.dimension_semantics<parallel>, #tpu.dimension_semantics<parallel>, #tpu.dimension_semantics<arbitrary>], iteration_bounds = array<i64: 1, 1, 1>, scalar_prefetch = 0 : i64, scratch_operands = 1 : i64, tpu.core_type = #tpu.core_type<tc>, window_params = [{transform_indices = @transform_0, window_bounds = array<i64: 16, 128>}, {transform_indices = @transform_1, window_bounds = array<i64: 128, 128>}, {transform_indices = @transform_2, window_bounds = array<i64: 1, 128>}, {transform_indices = @transform_3, window_bounds = array<i64: 16, 128>}, {transform_indices = @transform_4, window_bounds = array<i64: 128, 128>}, {transform_indices = @transform_5, window_bounds = array<i64: 16, 128>}]} {
    %c0_i32 = arith.constant 0 : i32
    %0 = arith.cmpi eq, %arg2, %c0_i32 : i32
    %1 = arith.extui %0 : i1 to i32
    %c0_i32_0 = arith.constant 0 : i32
    %2 = arith.cmpi ne, %1, %c0_i32_0 : i32
    scf.if %2 {
      %c0_10 = arith.constant 0 : index
      %c0_11 = arith.constant 0 : index
      %12 = vector.load %arg5[%c0_10, %c0_11] : memref<1x128xf32, #tpu.memory_space<vmem>>, vector<1x128xf32>
      %13 = vector.shape_cast %12 : vector<1x128xf32> to vector<1x128xf32>
      %14 = vector.broadcast %13 : vector<1x128xf32> to vector<16x128xf32>
      %c0_12 = arith.constant 0 : index
      %c0_13 = arith.constant 0 : index
      %15 = vector.load %arg9[%c0_12, %c0_13] : memref<16x128xf32, #tpu.memory_space<vmem>>, vector<16x128xf32>
      tpu.vector_store %arg9[%c0_12, %c0_13], %14 {strides = array<i32>} : memref<16x128xf32, #tpu.memory_space<vmem>>, vector<16x128xf32>,
    } else {
    }
    %c0 = arith.constant 0 : index
    %c0_1 = arith.constant 0 : index
    %3 = vector.load %arg9[%c0, %c0_1] : memref<16x128xf32, #tpu.memory_space<vmem>>, vector<16x128xf32>
    %c0_2 = arith.constant 0 : index
    %c0_3 = arith.constant 0 : index
    %4 = vector.load %arg3[%c0_2, %c0_3] : memref<16x128xbf16, #tpu.memory_space<vmem>>, vector<16x128xbf16>
    %c0_4 = arith.constant 0 : index
    %c0_5 = arith.constant 0 : index
    %5 = vector.load %arg4[%c0_4, %c0_5] : memref<128x128xbf16, #tpu.memory_space<vmem>>, vector<128x128xbf16>
    %cst = arith.constant dense<0.000000e+00> : vector<16x128xf32>
    %6 = tpu.matmul %4, %5, %cst {dimension_numbers = #tpu.dot_dimension_numbers<[1], [0], [0], [1], [0, 0, 1, 1], [], []>} : vector<16x128xbf16>, vector<128x128xbf16>, vector<16x128xf32> -> vector<16x128xf32>
    %7 = arith.addf %3, %6 : vector<16x128xf32>
    %c0_6 = arith.constant 0 : index
    %c0_7 = arith.constant 0 : index
    %8 = vector.load %arg9[%c0_6, %c0_7] : memref<16x128xf32, #tpu.memory_space<vmem>>, vector<16x128xf32>
    tpu.vector_store %arg9[%c0_6, %c0_7], %7 {strides = array<i32>} : memref<16x128xf32, #tpu.memory_space<vmem>>, vector<16x128xf32>,
    %c0_i32_8 = arith.constant 0 : i32
    %9 = arith.cmpi eq, %arg2, %c0_i32_8 : i32
    %10 = arith.extui %9 : i1 to i32
    %c0_i32_9 = arith.constant 0 : i32
    %11 = arith.cmpi ne, %10, %c0_i32_9 : i32
    scf.if %11 {
      %c0_10 = arith.constant 0 : index
      %c0_11 = arith.constant 0 : index
      %12 = vector.load %arg6[%c0_10, %c0_11] : memref<16x128xbf16, #tpu.memory_space<vmem>>, vector<16x128xbf16>
      %c0_12 = arith.constant 0 : index
      %c0_13 = arith.constant 0 : index
      %13 = vector.load %arg7[%c0_12, %c0_13] : memref<128x128xbf16, #tpu.memory_space<vmem>>, vector<128x128xbf16>
      %cst_14 = arith.constant dense<0.000000e+00> : vector<16x128xf32>
      %14 = tpu.matmul %12, %13, %cst_14 {dimension_numbers = #tpu.dot_dimension_numbers<[1], [0], [0], [1], [0, 0, 1, 1], [], []>} : vector<16x128xbf16>, vector<128x128xbf16>, vector<16x128xf32> -> vector<16x128xf32>
      %c0_15 = arith.constant 0 : index
      %c0_16 = arith.constant 0 : index
      %15 = vector.load %arg9[%c0_15, %c0_16] : memref<16x128xf32, #tpu.memory_space<vmem>>, vector<16x128xf32>
      %16 = arith.addf %15, %14 : vector<16x128xf32>
      %c0_17 = arith.constant 0 : index
      %c0_18 = arith.constant 0 : index
      %17 = vector.load %arg8[%c0_17, %c0_18] : memref<16x128xf32, #tpu.memory_space<vmem>>, vector<16x128xf32>
      tpu.vector_store %arg8[%c0_17, %c0_18], %16 {strides = array<i32>} : memref<16x128xf32, #tpu.memory_space<vmem>>, vector<16x128xf32>,
    } else {
    }
    return
  }
  func.func @transform_0(%arg0: i32, %arg1: i32, %arg2: i32) -> (i32, i32) {
    %c0_i32 = arith.constant 0 : i32
    return %arg0, %arg2 : i32, i32
  }
  func.func @transform_1(%arg0: i32, %arg1: i32, %arg2: i32) -> (i32, i32) {
    %c0_i32 = arith.constant 0 : i32
    return %arg2, %arg1 : i32, i32
  }
  func.func @transform_2(%arg0: i32, %arg1: i32, %arg2: i32) -> (i32, i32) {
    %c0_i32 = arith.constant 0 : i32
    %c0_i32_0 = arith.constant 0 : i32
    return %c0_i32, %arg1 : i32, i32
  }
  func.func @transform_3(%arg0: i32, %arg1: i32, %arg2: i32) -> (i32, i32) {
    %c0_i32 = arith.constant 0 : i32
    %c0_i32_0 = arith.constant 0 : i32
    return %arg0, %c0_i32 : i32, i32
  }
  func.func @transform_4(%arg0: i32, %arg1: i32, %arg2: i32) -> (i32, i32) {
    %c0_i32 = arith.constant 0 : i32
    %c0_i32_0 = arith.constant 0 : i32
    return %c0_i32, %arg1 : i32, i32
  }
  func.func @transform_5(%arg0: i32, %arg1: i32, %arg2: i32) -> (i32, i32) {
    %c0_i32 = arith.constant 0 : i32
    return %arg0, %arg1 : i32, i32
  }
}

</mosaic_0001>

<bundles_post_ra>
// kernel: forward.1
= control target key start
LH: loop header
LB: loop body
LE: loop exit
PB: predicated region body
PF: predicated region fallthrough
CT: control target
= control target key end

     0   :  { %v380_v0 = vmov 0.0   ;;  %vm381_vm0 = vmmov 0   ;;  %s475_s1 = inlined_call_operand.vmem [shape: bf16[128,128], index: 1, kind: input, shape index: {}]   ;;  %s476_s4 = inlined_call_operand.vmem [shape: bf16[128,128], index: 4, kind: input, shape index: {}]   ;;  %s477_s0 = inlined_call_operand.vmem [shape: bf16[16,128], index: 0, kind: input, shape index: {}]   ;;  %s478_s3 = inlined_call_operand.vmem [shape: bf16[16,128], index: 3, kind: input, shape index: {}]   ;;  %s479_s2 = inlined_call_operand.vmem [shape: f32[1,128], index: 2, kind: input, shape index: {}]   ;;  %s480_s5 = inlined_call_operand.vmem [shape: f32[16,128], index: 5, kind: output, shape index: {}]  }
   0x1   :  { %316 = vmatprep.subr.bf16.mxu1 %v380_v0  ;;  %336 = vmatprep.subr.bf16.mxu0 %v380_v0  ;;  %v362_v1 = vld [vmem:[%s475_s1] sm:$0xff]   ;;  %v364_v3 = vld [vmem:[%s475_s1 + $0x8] sm:$0xff]   ;;  %v366_v5 = vld [vmem:[%s475_s1 + $0x10] sm:$0xff]  }
   0x2   :  { %v363_v2 = vld [vmem:[%s476_s4] sm:$0xff]   ;;  %332 = vmatprep.mubr.msk.bf16.mxu1 %vm381_vm0, %v380_v0  ;;  %352 = vmatprep.mubr.msk.bf16.mxu0 %vm381_vm0, %v380_v0  ;;  %v365_v4 = vld [vmem:[%s476_s4 + $0x8] sm:$0xff]   ;;  %v367_v6 = vld [vmem:[%s476_s4 + $0x10] sm:$0xff]  }
   0x3   :  { %317 = vmatpush3.bf16.msra.mxu1 %v362_v1  ;;  %337 = vmatpush3.bf16.msra.mxu0 %v363_v2  ;;  %v368_v7 = vld [vmem:[%s475_s1 + $0x18] sm:$0xff]   ;;  %v370_v9 = vld [vmem:[%s475_s1 + $0x20] sm:$0xff]   ;;  %v372_v11 = vld [vmem:[%s475_s1 + $0x28] sm:$0xff]  }
   0x4   :  { %318 = vmatprep.subr.bf16.mxu1 %v380_v0  ;;  %338 = vmatprep.subr.bf16.mxu0 %v380_v0  ;;  %v369_v8 = vld [vmem:[%s476_s4 + $0x18] sm:$0xff]   ;;  %v371_v10 = vld [vmem:[%s476_s4 + $0x20] sm:$0xff]   ;;  %v373_v12 = vld [vmem:[%s476_s4 + $0x28] sm:$0xff]  }
   0x5   :  { %v374_v13 = vld [vmem:[%s475_s1 + $0x30] sm:$0xff]   ;;  %v376_v15 = vld [vmem:[%s475_s1 + $0x38] sm:$0xff]   ;;  %v378_v17 = vld [vmem:[%s477_s0] sm:$0xff]  }
   0x6   :  { %v375_v14 = vld [vmem:[%s476_s4 + $0x30] sm:$0xff]   ;;  %v377_v16 = vld [vmem:[%s476_s4 + $0x38] sm:$0xff]   ;;  %v379_v18 = vld [vmem:[%s478_s3] sm:$0xff]  }
   0x7   :  { %319 = vmatpush3.bf16.msra.mxu1 %v364_v3  ;;  %339 = vmatpush3.bf16.msra.mxu0 %v365_v4  ;;  %v279_v19 = vld [vmem:[%s479_s2] ss:$0 sm:$0xff] }
   0x8   :  { %320 = vmatprep.subr.bf16.mxu1 %v380_v0  ;;  %340 = vmatprep.subr.bf16.mxu0 %v380_v0 }
   0xb   :  { %321 = vmatpush3.bf16.msra.mxu1 %v366_v5  ;;  %341 = vmatpush3.bf16.msra.mxu0 %v367_v6 }
   0xc   :  { %322 = vmatprep.subr.bf16.mxu1 %v380_v0  ;;  %342 = vmatprep.subr.bf16.mxu0 %v380_v0 }
   0xf   :  { %323 = vmatpush3.bf16.msra.mxu1 %v368_v7  ;;  %343 = vmatpush3.bf16.msra.mxu0 %v369_v8 }
  0x10   :  { %324 = vmatprep.subr.bf16.mxu1 %v380_v0  ;;  %344 = vmatprep.subr.bf16.mxu0 %v380_v0 }
  0x13   :  { %325 = vmatpush3.bf16.msra.mxu1 %v370_v9  ;;  %345 = vmatpush3.bf16.msra.mxu0 %v371_v10 }
  0x14   :  { %326 = vmatprep.subr.bf16.mxu1 %v380_v0  ;;  %346 = vmatprep.subr.bf16.mxu0 %v380_v0 }
  0x17   :  { %327 = vmatpush3.bf16.msra.mxu1 %v372_v11  ;;  %347 = vmatpush3.bf16.msra.mxu0 %v373_v12 }
  0x18   :  { %328 = vmatprep.subr.bf16.mxu1 %v380_v0  ;;  %348 = vmatprep.subr.bf16.mxu0 %v380_v0 }
  0x1b   :  { %329 = vmatpush3.bf16.msra.mxu1 %v374_v13  ;;  %349 = vmatpush3.bf16.msra.mxu0 %v375_v14 }
  0x1c   :  { %330 = vmatprep.subr.bf16.mxu1 %v380_v0  ;;  %350 = vmatprep.subr.bf16.mxu0 %v380_v0 }
  0x1f   :  { %331 = vmatpush3.bf16.msra.mxu1 %v376_v15  ;;  %351 = vmatpush3.bf16.msra.mxu0 %v377_v16 }
  0x22   :  { %333 = vmatmul.mubr.bf16.vlgmr.msra.gmra.mrb[0].mxu1 %v378_v17  ;;  %353 = vmatmul.mubr.bf16.vlgmr.msra.gmra.mrb[0].mxu0 %v379_v18 }
  0xf5   :  { %v142_v20 = vpop.f32.mrb[0].mxu1  ;;  %v262_v22 = vpop.f32.mrb[0].mxu0 }
  0xf6   :  { %v149_v21 = vadd.f32 %v279_v19, %v142_v20  ;;  %v334_v23 = vpop.f32.mrb[1].mxu1  ;;  %v354_v24 = vpop.f32.mrb[1].mxu0 }
  0xf7   :  { %v145_v25 = vpop.f32.mrb[2].mxu1  ;;  %v265_v28 = vpop.f32.mrb[2].mxu0 }
  0xf8   :  { %v271_v26 = vadd.f32 %v262_v22, %v149_v21  ;;  %v150_v27 = vadd.f32 %v279_v19, %v145_v25  ;;  %v335_v29 = vpop.f32.mrb[3].mxu1  ;;  %v355_v30 = vpop.f32.mrb[3].mxu0 }
  0xfa   :  { %273 = vst [vmem:[%s480_s5] sm:$0xff] %v271_v26  ;;  %v272_v31 = vadd.f32 %v265_v28, %v150_v27 }
  0xfc   :  { %274 = vst [vmem:[%s480_s5 + $0x8] sm:$0xff] %v272_v31 }

</bundles_post_ra>
